<compile_context>
chip_gen: v7x
topology: tpu7x:2x2x1
jax: 0.10.0
libtpu: 0.0.40
codegen_flags: <defaults>
</compile_context>

<pallas_src>
import jax
import jax.numpy as jnp
from jax import lax
from jax.experimental import pallas as pl
from jax.experimental.pallas import tpu as pltpu

_MIB = 1024 * 1024


def pffn_kernel(x_ref, w1_ref, b1_ref, w2_ref, b2_ref, o_ref):
    # x_ref / o_ref: (Bt, H, tl) tile of the NCL tensor (channels x positions).
    # w1_ref / w2_ref: (H, H) VMEM-resident weights.  b1_ref / b2_ref: (H, 1) f32.
    w1 = w1_ref[...]
    w2 = w2_ref[...]
    b1 = b1_ref[...]          # loaded once; broadcasts over positions below
    b2 = b2_ref[...]
    bt = x_ref.shape[0]

    def body(b, carry):
        x = x_ref[b]                                                   # (H, tl)
        h = jnp.dot(w1, x.astype(w1.dtype), preferred_element_type=jnp.float32)
        h = jnp.maximum(h + b1, 0.0)                                   # bias + ReLU, f32
        # dropout -> identity (eval mode)
        y = jnp.dot(w2, h.astype(w2.dtype), preferred_element_type=jnp.float32)
        o_ref[b] = (y + b2).astype(o_ref.dtype)
        # dropout -> identity (eval mode)
        return carry

    lax.fori_loop(0, bt, body, 0, unroll=True)


def _vmem_budget_bytes():
    """Scoped-VMEM budget with headroom, derived from the actual chip."""
    try:
        cap = int(pltpu.get_tpu_info().vmem_capacity_bytes)
    except Exception:
        cap = 64 * _MIB  # conservative fallback (v7x per-TC VMEM)
    # v7x (64 MiB) -> ~56 MiB; v5e/v6e (128 MiB) -> ~112 MiB.
    return max(16 * _MIB, min(cap - 8 * _MIB, (cap * 7) // 8))


def pointwise_ffn(x_ncl, w1, b1, w2, b2, *, tl=1024, out_dtype=None):
    """Eval-mode SASRec pointwise FFN on the native NCL layout.

    x_ncl: (B, H, L).  w1, w2: (H, H) Conv1d weights with the kernel dim
    squeezed (a trailing kernel dim of size 1 is also accepted).  b1, b2: (H,).
    Returns (B, H, L) in out_dtype (default: x dtype; pass/keep bf16
    activations on v6e/v7x to halve HBM traffic).
    """
    if w1.ndim == 3:
        w1 = w1[..., 0]
    if w2.ndim == 3:
        w2 = w2[..., 0]
    B, H, L = x_ncl.shape
    x_dtype = x_ncl.dtype
    out_dtype = x_dtype if out_dtype is None else jnp.dtype(out_dtype)

    # One-time host-side channel pad to a sublane multiple (only if H % 8 != 0,
    # e.g. SASRec's default hidden_units=50) to avoid per-tile relayouts.
    Hp = ((H + 7) // 8) * 8
    if Hp != H:
        x_ncl = jnp.pad(x_ncl, ((0, 0), (0, Hp - H), (0, 0)))
        w1 = jnp.pad(w1, ((0, Hp - H), (0, Hp - H)))
        w2 = jnp.pad(w2, ((0, Hp - H), (0, Hp - H)))
        b1 = jnp.pad(b1, ((0, Hp - H),))
        b2 = jnp.pad(b2, ((0, Hp - H),))

    b1_col = b1.astype(jnp.float32).reshape(Hp, 1)
    b2_col = b2.astype(jnp.float32).reshape(Hp, 1)

    # Position tile (lane axis): either the whole sequence in one tile, or a
    # large multiple of 128.  No host-side padding of L: the partial trailing
    # block gets a bounded DMA + masked store, and garbage lanes stay confined
    # because the matmuls contract over H, not L.
    if L <= int(tl):
        tl = L
    else:
        tl = max(128, (int(tl) // 128) * 128)

    itemsize = max(jnp.dtype(x_dtype).itemsize, jnp.dtype(out_dtype).itemsize)
    w_bytes = 2 * (2 * Hp * Hp * jnp.dtype(w1.dtype).itemsize)  # 2x-buffered w1+w2
    fixed = w_bytes + 2 * _MIB                                  # biases + headroom
    budget = _vmem_budget_bytes()

    def step_bytes(bt, tl_):
        return 4 * bt * Hp * tl_ * itemsize  # double-buffered x + out tiles

    # If even a single (H, tl) tile blows the budget (huge H*L), shrink tl.
    while fixed + step_bytes(1, tl) > budget and tl > 128:
        tl = max(128, ((tl // 2 + 127) // 128) * 128)
    num_l = pl.cdiv(L, tl)

    # Pick Bt (batch rows per grid step): amortize per-step overhead, keep
    # double-buffered tiles + resident weights inside the VMEM budget, and aim
    # for a few MB of data movement per operand per step.
    Bt = 1
    for cand in range(2, min(B, 32) + 1):
        if fixed + step_bytes(cand, tl) > budget:
            break
        if cand * Hp * tl * itemsize > 8 * _MIB:
            break
        Bt = cand
    if num_l == 1 and B > 1:
        # Keep >=2 steps along a "parallel" axis so both v7x TensorCores get work.
        Bt = min(Bt, pl.cdiv(B, 2))

    grid = (pl.cdiv(B, Bt), num_l)

    vmem_limit = int(min(max(fixed + step_bytes(Bt, tl) + 2 * _MIB, 32 * _MIB),
                         budget))

    cost = pl.CostEstimate(
        flops=4 * B * L * H * H,
        transcendentals=0,
        bytes_accessed=(B * L * H * (jnp.dtype(x_dtype).itemsize
                                     + jnp.dtype(out_dtype).itemsize)
                        + 2 * H * H * jnp.dtype(w1.dtype).itemsize
                        + 2 * H * 4),
    )

    out = pl.pallas_call(
        pffn_kernel,
        out_shape=jax.ShapeDtypeStruct((B, Hp, L), out_dtype),
        grid_spec=pltpu.PrefetchScalarGridSpec(
            num_scalar_prefetch=0,
            grid=grid,
            in_specs=[
                pl.BlockSpec((Bt, Hp, tl), lambda b, l: (b, 0, l)),  # x tiles
                pl.BlockSpec((Hp, Hp), lambda b, l: (0, 0)),         # w1 (resident)
                pl.BlockSpec((Hp, 1), lambda b, l: (0, 0)),          # b1
                pl.BlockSpec((Hp, Hp), lambda b, l: (0, 0)),         # w2 (resident)
                pl.BlockSpec((Hp, 1), lambda b, l: (0, 0)),          # b2
            ],
            out_specs=pl.BlockSpec((Bt, Hp, tl), lambda b, l: (b, 0, l)),
        ),
        compiler_params=pltpu.CompilerParams(
            dimension_semantics=("parallel", "parallel"),
            vmem_limit_bytes=vmem_limit,
        ),
        cost_estimate=cost,
    )(x_ncl, w1, b1_col, w2, b2_col)

    if Hp != H:
        out = out[:, :H, :]  # extra pass only in the odd-H case
    return out


def reference(x_ncl, w1, b1, w2, b2):
    # Pure-JAX reference mirroring conv1d(k=1) + relu + conv1d(k=1).
    h = jnp.einsum("oc,bcl->bol", w1, x_ncl) + b1[None, :, None]
    h = jnp.maximum(h, 0.0)
    return jnp.einsum("oc,bcl->bol", w2, h) + b2[None, :, None]


if __name__ == "__main__":
    B, H, L = 2, 32, 8  # batch, hidden_dim, seq_len

    key = jax.random.PRNGKey(0)
    kx, k1, k2, k3, k4 = jax.random.split(key, 5)

    x = jax.random.normal(kx, (B, H, L), dtype=jnp.float32)
    # Conv1d weights (out_channels, in_channels), kernel dim of size 1 squeezed.
    w1 = jax.random.normal(k1, (H, H), dtype=jnp.float32) * 0.1
    b1 = jax.random.normal(k2, (H,), dtype=jnp.float32) * 0.1
    w2 = jax.random.normal(k3, (H, H), dtype=jnp.float32) * 0.1
    b2 = jax.random.normal(k4, (H,), dtype=jnp.float32) * 0.1

    # f32 path: tight tolerance vs. the pure-JAX reference.
    out = jax.block_until_ready(pointwise_ffn(x, w1, b1, w2, b2))
    ref = reference(x, w1, b1, w2, b2)
    assert out.shape == (B, H, L)
    assert jnp.allclose(out, ref, atol=1e-5, rtol=1e-5)

    # bf16-activation path (the bandwidth lever on v6e/v7x): bf16 x/out in HBM,
    # f32 accumulation and f32 bias/ReLU epilogue inside the kernel.
    x_bf16 = x.astype(jnp.bfloat16)
    out_bf = jax.block_until_ready(pointwise_ffn(x_bf16, w1, b1, w2, b2))
    ref_bf = reference(x_bf16.astype(jnp.float32), w1, b1, w2, b2)
    assert out_bf.shape == (B, H, L)
    assert out_bf.dtype == jnp.bfloat16
    assert jnp.allclose(out_bf.astype(jnp.float32), ref_bf, atol=3e-2, rtol=3e-2)

    print("KERNEL_OK")
</pallas_src>

<mosaic_0001>
module attributes {stable_mosaic.version = 11 : i64} {
  func.func @pffn_kernel(%arg0: i32, %arg1: i32, %arg2: memref<1x32x8xf32, #tpu.memory_space<vmem>>, %arg3: memref<32x32xf32, #tpu.memory_space<vmem>>, %arg4: memref<32x1xf32, #tpu.memory_space<vmem>>, %arg5: memref<32x32xf32, #tpu.memory_space<vmem>>, %arg6: memref<32x1xf32, #tpu.memory_space<vmem>>, %arg7: memref<1x32x8xf32, #tpu.memory_space<vmem>>) attributes {dimension_semantics = [#tpu.dimension_semantics<parallel>, #tpu.dimension_semantics<parallel>], iteration_bounds = array<i64: 2, 1>, scalar_prefetch = 0 : i64, scratch_operands = 0 : i64, tpu.core_type = #tpu.core_type<tc>, window_params = [{transform_indices = @transform_0, window_bounds = array<i64: 1, 32, 8>}, {pipeline_mode = #tpu.pipeline_mode<synchronous>, transform_indices = @transform_1, window_bounds = array<i64: 32, 32>}, {pipeline_mode = #tpu.pipeline_mode<synchronous>, transform_indices = @transform_2, window_bounds = array<i64: 32, 1>}, {pipeline_mode = #tpu.pipeline_mode<synchronous>, transform_indices = @transform_3, window_bounds = array<i64: 32, 32>}, {pipeline_mode = #tpu.pipeline_mode<synchronous>, transform_indices = @transform_4, window_bounds = array<i64: 32, 1>}, {transform_indices = @transform_5, window_bounds = array<i64: 1, 32, 8>}]} {
    %c0 = arith.constant 0 : index
    %c0_0 = arith.constant 0 : index
    %0 = vector.load %arg3[%c0, %c0_0] : memref<32x32xf32, #tpu.memory_space<vmem>>, vector<32x32xf32>
    %c0_1 = arith.constant 0 : index
    %c0_2 = arith.constant 0 : index
    %1 = vector.load %arg5[%c0_1, %c0_2] : memref<32x32xf32, #tpu.memory_space<vmem>>, vector<32x32xf32>
    %c0_3 = arith.constant 0 : index
    %c0_4 = arith.constant 0 : index
    %2 = vector.load %arg4[%c0_3, %c0_4] : memref<32x1xf32, #tpu.memory_space<vmem>>, vector<32x1xf32>
    %c0_5 = arith.constant 0 : index
    %c0_6 = arith.constant 0 : index
    %3 = vector.load %arg6[%c0_5, %c0_6] : memref<32x1xf32, #tpu.memory_space<vmem>>, vector<32x1xf32>
    %c0_i32 = arith.constant 0 : i32
    %4 = arith.index_cast %c0_i32 : i32 to index
    %c0_7 = arith.constant 0 : index
    %c0_8 = arith.constant 0 : index
    %5 = vector.load %arg2[%4, %c0_7, %c0_8] : memref<1x32x8xf32, #tpu.memory_space<vmem>>, vector<1x32x8xf32>
    %6 = vector.shape_cast %5 : vector<1x32x8xf32> to vector<32x8xf32>
    %cst = arith.constant dense<0.000000e+00> : vector<32x8xf32>
    %7 = tpu.matmul %0, %6, %cst {dimension_numbers = #tpu.dot_dimension_numbers<[1], [0], [0], [1], [0, 0, 1, 1], [], []>} : vector<32x32xf32>, vector<32x8xf32>, vector<32x8xf32> -> vector<32x8xf32>
    %8 = vector.broadcast %2 : vector<32x1xf32> to vector<32x8xf32>
    %9 = arith.addf %7, %8 : vector<32x8xf32>
    %cst_9 = arith.constant 0.000000e+00 : f32
    %10 = vector.broadcast %cst_9 : f32 to vector<32x8xf32>
    %11 = arith.maximumf %9, %10 : vector<32x8xf32>
    %cst_10 = arith.constant dense<0.000000e+00> : vector<32x8xf32>
    %12 = tpu.matmul %1, %11, %cst_10 {dimension_numbers = #tpu.dot_dimension_numbers<[1], [0], [0], [1], [0, 0, 1, 1], [], []>} : vector<32x32xf32>, vector<32x8xf32>, vector<32x8xf32> -> vector<32x8xf32>
    %13 = vector.broadcast %3 : vector<32x1xf32> to vector<32x8xf32>
    %14 = arith.addf %12, %13 : vector<32x8xf32>
    %15 = arith.index_cast %c0_i32 : i32 to index
    %c0_11 = arith.constant 0 : index
    %c0_12 = arith.constant 0 : index
    %16 = vector.load %arg7[%15, %c0_11, %c0_12] : memref<1x32x8xf32, #tpu.memory_space<vmem>>, vector<1x32x8xf32>
    %17 = vector.shape_cast %16 : vector<1x32x8xf32> to vector<32x8xf32>
    %18 = vector.shape_cast %14 : vector<32x8xf32> to vector<1x32x8xf32>
    tpu.vector_store %arg7[%15, %c0_11, %c0_12], %18 {strides = array<i32>} : memref<1x32x8xf32, #tpu.memory_space<vmem>>, vector<1x32x8xf32>,
    %c1_i32 = arith.constant 1 : i32
    return
  }
  func.func @transform_0(%arg0: i32, %arg1: i32) -> (i32, i32, i32) {
    %c0_i32 = arith.constant 0 : i32
    %c0_i32_0 = arith.constant 0 : i32
    return %arg0, %c0_i32, %arg1 : i32, i32, i32
  }
  func.func @transform_1(%arg0: i32, %arg1: i32) -> (i32, i32) {
    %c0_i32 = arith.constant 0 : i32
    %c0_i32_0 = arith.constant 0 : i32
    %c0_i32_1 = arith.constant 0 : i32
    return %c0_i32, %c0_i32_0 : i32, i32
  }
  func.func @transform_2(%arg0: i32, %arg1: i32) -> (i32, i32) {
    %c0_i32 = arith.constant 0 : i32
    %c0_i32_0 = arith.constant 0 : i32
    %c0_i32_1 = arith.constant 0 : i32
    return %c0_i32, %c0_i32_0 : i32, i32
  }
  func.func @transform_3(%arg0: i32, %arg1: i32) -> (i32, i32) {
    %c0_i32 = arith.constant 0 : i32
    %c0_i32_0 = arith.constant 0 : i32
    %c0_i32_1 = arith.constant 0 : i32
    return %c0_i32, %c0_i32_0 : i32, i32
  }
  func.func @transform_4(%arg0: i32, %arg1: i32) -> (i32, i32) {
    %c0_i32 = arith.constant 0 : i32
    %c0_i32_0 = arith.constant 0 : i32
    %c0_i32_1 = arith.constant 0 : i32
    return %c0_i32, %c0_i32_0 : i32, i32
  }
  func.func @transform_5(%arg0: i32, %arg1: i32) -> (i32, i32, i32) {
    %c0_i32 = arith.constant 0 : i32
    %c0_i32_0 = arith.constant 0 : i32
    return %arg0, %c0_i32, %arg1 : i32, i32, i32
  }
}

</mosaic_0001>

<bundles_post_ra>
// kernel: tpu_custom_call.1
= control target key start
LH: loop header
LB: loop body
LE: loop exit
PB: predicated region body
PF: predicated region fallthrough
CT: control target
= control target key end

     0   :  { %s766_s18 = smov 0   ;;  %s768_s19 = smov 0   ;;  %s862_s0 = inlined_call_operand.vmem [shape: f32[2,32,8], index: 0, kind: input, shape index: {}]   ;;  %s863_s1 = inlined_call_operand.vmem [shape: f32[32,32], index: 1, kind: input, shape index: {}]   ;;  %s864_s2 = inlined_call_operand.vmem [shape: f32[32,1], index: 2, kind: input, shape index: {}]   ;;  %s865_s3 = inlined_call_operand.vmem [shape: f32[32,32], index: 3, kind: input, shape index: {}]   ;;  %s866_s4 = inlined_call_operand.vmem [shape: f32[32,1], index: 4, kind: input, shape index: {}]   ;;  %s867_s5 = inlined_call_operand.vmem [shape: f32[2,32,8], index: 5, kind: output, shape index: {}]  }
   0x1   :  { %s770_s20 = smov 0  }
   0x2 LB: > { %s27_s21 = sadd.s32 1, %s729_s19  ;;  %p607_p0 = scmp.ge.s32.totalorder %s733_s20, 1  ;;  %s733_s20 = sphi %s770_s20, %s15_s20   ;;  %s729_s19 = sphi %s768_s19, %s869_s19   ;;  %s725_s18 = sphi %s766_s18, %s868_s18  }
   0x3   : > { %p29_p1 = scmp.ge.s32.totalorder %s27_s21, 2  ;;  %p206_p2 = scmp.lt.s32.totalorder %s733_s20, 3 }
   0x5   : > { %s871_s21 = smov (%p29_p1, %s27_s21), 0  ;;  %p207_p3 = pnand %p607_p0, %p206_p2 }
   0x6   : > { %p240_p4 = scmp.lt.s32.totalorder (!%p207_p3), %s725_s18, 1  ;;  %v256_v0 = vld [vmem:[%s863_s1] sm:$0xff] (!%p207_p3)  ;;  %vm296_vm0 = vcmask (!%p207_p3), 261120   ;;  %v735_v1 = vmov (!%p207_p3), 0   ;;  %v266_v3 = vld [vmem:[%s864_s2 + $0x10] sm:$0xff] (!%p207_p3)  ;;  %v265_v4 = vld [vmem:[%s864_s2 + $0x8] sm:$0xff] (!%p207_p3) }
   0x7   : > { %210 = sbr.rel (%p207_p3) target bundleno = 475 (0x1db), region = 40  ;;  %648 = vmatprep.mubr.msk.f32.mxu0 (!%p207_p3), %vm296_vm0, %v256_v0  ;;  %709 = vset.pattern.permute.xlu0 (!%p207_p3), %v735_v1  ;;  %v264_v2 = vld [vmem:[%s864_s2] sm:$0xff] (!%p207_p3)  ;;  %v267_v5 = vld [vmem:[%s864_s2 + $0x18] sm:$0xff] (!%p207_p3)  ;;  %v269_v13 = vld [vmem:[%s866_s4 + $0x8] sm:$0xff] (!%p207_p3)  ;;  %vm515_vm1 = vcmask (!%p207_p3), 64512  }
   0x8   : > { %278 = vperm.xlu0 (!%p207_p3), %709, %v264_v2   ;;  %710 = vset.pattern.permute.xlu1 (!%p207_p3), %v735_v1  ;;  %v268_v11 = vld [vmem:[%s866_s4] sm:$0xff] (!%p207_p3)  ;;  %v270_v14 = vld [vmem:[%s866_s4 + $0x10] sm:$0xff] (!%p207_p3)  ;;  %v271_v15 = vld [vmem:[%s866_s4 + $0x18] sm:$0xff] (!%p207_p3) }
   0x9   : > { %288 = vperm.xlu1 (!%p207_p3), %710, %v266_v3   ;;  %v257_v16 = vld [vmem:[%s863_s1 + $0x8] sm:$0xff] (!%p207_p3)  ;;  %v258_v17 = vld [vmem:[%s863_s1 + $0x10] sm:$0xff] (!%p207_p3)  ;;  %v259_v18 = vld [vmem:[%s863_s1 + $0x18] sm:$0xff] (!%p207_p3) }
   0xa   : > { %v260_v19 = vld [vmem:[%s865_s3] sm:$0xff] (!%p207_p3)  ;;  %v261_v38 = vld [vmem:[%s865_s3 + $0x8] sm:$0xff] (!%p207_p3)  ;;  %v262_v39 = vld [vmem:[%s865_s3 + $0x10] sm:$0xff] (!%p207_p3) }
   0xb   : > { %662 = vmatprep.mubr.msk.f32.mxu1 (!%p207_p3), %vm296_vm0, %v260_v19  ;;  %v263_v40 = vld [vmem:[%s865_s3 + $0x18] sm:$0xff] (!%p207_p3) }
   0xc   : > { %283 = vperm.xlu0 (!%p207_p3), %709, %v265_v4  }
   0xd   : > { %293 = vperm.xlu1 (!%p207_p3), %710, %v267_v5  }
   0xe   : > { %s873_s18 = smov (!%p240_p4, %s725_s18), 1 }
   0xf   : > { %s622_s30 = sshll.u32 %s873_s18, 5 }
  0x10   : > { %s247_s10 = scalar_lea.vmem %s862_s0, %s622_s30  ;;  %400 = vperm.xlu0 %709, %v268_v11   ;;  %s255_s15 = scalar_lea.vmem %s867_s5, %s622_s30 }
  0x11   : > { %v272_v6 = vld [vmem:[%s247_s10] sm:$0xff]  ;;  %v273_v7 = vld [vmem:[%s247_s10 + $0x8] sm:$0xff]  ;;  %v274_v8 = vld [vmem:[%s247_s10 + $0x10] sm:$0xff]  ;;  %405 = vperm.xlu1 %710, %v269_v13  }
  0x12   : > { %v668_v9 = vpack.c.bf16 %v273_v7, %v272_v6  ;;  %v275_v10 = vld [vmem:[%s247_s10 + $0x18] sm:$0xff] }
  0x13   : > { %v672_v12 = vpack.c.bf16 %v275_v10, %v274_v8 }
  0x14   : > { %669 = vmatprep.subr.bf16.mxu0 %v668_v9  ;;  %410 = vperm.xlu0 %709, %v270_v14  }
  0x15   : > { %671 = vmatpush3.bf16.msra.mxu0 %v668_v9  ;;  %415 = vperm.xlu1 %710, %v271_v15  }
  0x16   : > { %673 = vmatprep.subr.bf16.mxu0 %v672_v12 }
  0x19   : > { %675 = vmatpush3.bf16.msra.mxu0 %v672_v12 }
  0x1c   : > { %649 = vmatmul.mubr.msk.f32.vlgmr.msra.gmra.mrb[0].mxu0 %vm296_vm0, %v257_v16 }
  0x1d   : > { %651 = vmatprep.mubr.msk.f32.mxu0 %vm296_vm0, %v258_v17 }
  0x20   : > { %652 = vmatmul.mubr.msk.f32.gmra.mrb[2].mxu0 %vm296_vm0, %v259_v18 }
  0x87   : > { %v279_v20 = vpop.permute.xlu0 %278 }
  0x88   : > { %v289_v21 = vpop.permute.xlu1 %288 }
  0x8b   : > { %v284_v22 = vpop.permute.xlu0 %283 }
  0x8c   : > { %v294_v28 = vpop.permute.xlu1 %293 }
  0x8f   : > { %v401_v42 = vpop.permute.xlu0 %400 }
  0x90   : > { %v406_v41 = vpop.permute.xlu1 %405 }
  0x93   : > { %v411_v49 = vpop.permute.xlu0 %410 }
  0x94   : > { %v416_v47 = vpop.permute.xlu1 %415 }
  0xef   : > { %v650_v23 = vpop.f32.mrb[0].mxu0 }
  0xf0   : > { %v381_v24 = vadd.f32 %v650_v23, %v284_v22  ;;  %v375_v25 = vpop.f32.mrb[1].mxu0 }
  0xf1   : > { %v376_v26 = vadd.f32 %v375_v25, %v279_v20 }
  0xf2   : > { %v395_v27 = vmax.f32 %v381_v24, 0.0 }
  0xf3   : > { %v394_v29 = vmax.f32 %v376_v26, 0.0  ;;  %v653_v30 = vpop.f32.mrb[2].mxu0 }
  0xf4   : > { %v391_v31 = vadd.f32 %v653_v30, %v294_v28  ;;  %v385_v32 = vpop.f32.mrb[3].mxu0 }
  0xf5   : > { %v386_v33 = vadd.f32 %v385_v32, %v289_v21  ;;  %v676_v34 = vpack.c.bf16 %v395_v27, %v394_v29 }
  0xf6   : > { %v397_v35 = vmax.f32 %v391_v31, 0.0 }
  0xf7   : > { %v396_v36 = vmax.f32 %v386_v33, 0.0  ;;  %677 = vmatprep.subr.bf16.mxu1 %v676_v34 }
  0xf8   : > { %679 = vmatpush3.bf16.msra.mxu1 %v676_v34 }
  0xf9   : > { %v680_v37 = vpack.c.bf16 %v397_v35, %v396_v36 }
  0xfb   : > { %681 = vmatprep.subr.bf16.mxu1 %v680_v37 }
  0xfc   : > { %683 = vmatpush3.bf16.msra.mxu1 %v680_v37 }
  0xff   : > { %663 = vmatmul.mubr.msk.f32.vlgmr.msra.gmra.mrb[0].mxu1 %vm296_vm0, %v261_v38 }
 0x100   : > { %665 = vmatprep.mubr.msk.f32.mxu1 %vm296_vm0, %v262_v39 }
 0x103   : > { %666 = vmatmul.mubr.msk.f32.gmra.mrb[2].mxu1 %vm296_vm0, %v263_v40 }
 0x1d2   : > { %v664_v43 = vpop.f32.mrb[0].mxu1 }
 0x1d3   : > { %v502_v44 = vadd.f32 %v664_v43, %v406_v41  ;;  %v496_v45 = vpop.f32.mrb[1].mxu1 }
 0x1d4   : > { %v497_v46 = vadd.f32 %v496_v45, %v401_v42 }
 0x1d5   : > { %517 = vst.msk [vmem:[%s255_s15 + $0x8] sm:$0xff] %vm515_vm1, %v502_v44 }
 0x1d6   : > { %516 = vst.msk [vmem:[%s255_s15] sm:$0xff] %vm515_vm1, %v497_v46  ;;  %v667_v48 = vpop.f32.mrb[2].mxu1 }
 0x1d7   : > { %v512_v50 = vadd.f32 %v667_v48, %v416_v47  ;;  %v506_v51 = vpop.f32.mrb[3].mxu1 }
 0x1d8   : > { %v507_v52 = vadd.f32 %v506_v51, %v411_v49 }
 0x1d9   : > { %519 = vst.msk [vmem:[%s255_s15 + $0x18] sm:$0xff] %vm515_vm1, %v512_v50 }
 0x1da   : > { %518 = vst.msk [vmem:[%s255_s15 + $0x10] sm:$0xff] %vm515_vm1, %v507_v52 }
 0x1db PF: > { %s15_s20 = sadd.s32 1, %s733_s20   ;;  %s868_s18 = smov %s729_s19 }
 0x1dc   : > { %p12_p5 = scmp.ge.s32.totalorder %s15_s20, 4   ;;  %s869_s19 = smov %s871_s21 }
 0x1de   :  { %14 = sbr.rel (!%p12_p5) target bundleno = 2 (0x2), region = 70 }

</bundles_post_ra>
